<compile_context>
chip_gen: v6e
topology: v6e:2x2x1
jax: 0.10.0
libtpu: 0.0.40
codegen_flags: <defaults>
</compile_context>

<pallas_src>
import functools

import jax
import jax.numpy as jnp
from jax import lax
from jax.experimental import pallas as pl
from jax.experimental.pallas import tpu as pltpu


# ----------------------------------------------------------------------------
# Kernel 1: tiled GCN encoder   logits = (A_norm @ X) @ W
# ----------------------------------------------------------------------------

def gcn_encoder_kernel(a_ref, x_ref, w_ref, o_ref, acc_ref):
    """grid = (N//TM, N//TK); axis 1 reduces over adjacency columns."""
    @pl.when(pl.program_id(1) == 0)
    def _():
        acc_ref[...] = jnp.zeros_like(acc_ref)

    acc_ref[...] += jnp.dot(a_ref[...], x_ref[...],
                            preferred_element_type=jnp.float32)

    @pl.when(pl.program_id(1) == pl.num_programs(1) - 1)
    def _():
        o_ref[...] = jnp.dot(acc_ref[...].astype(w_ref.dtype), w_ref[...],
                             preferred_element_type=jnp.float32)


def _pick_tile(n, align, target):
    """Largest multiple of `align` that divides n and is <= target, else n."""
    if n <= target:
        return n
    t = (target // align) * align
    while t >= align:
        if n % t == 0:
            return t
        t -= align
    return n


def gcn_encode(a_norm, x, w, *, compute_dtype=jnp.float32):
    n = a_norm.shape[0]
    f = x.shape[1]
    d = w.shape[1]
    # TM/TK ~256 targets v6e scoped VMEM; on v5e/v7x re-derive against 16/32 MiB.
    tm = _pick_tile(n, 8, 256)      # sublane tile over output rows
    tk = _pick_tile(n, 128, 256)    # lane tile over adjacency columns
    grid = (n // tm, n // tk)

    a_norm = a_norm.astype(compute_dtype)   # set compute_dtype=bf16 on v6e/v7x
    x = x.astype(compute_dtype)
    w = w.astype(compute_dtype)

    return pl.pallas_call(
        gcn_encoder_kernel,
        out_shape=jax.ShapeDtypeStruct((n, d), jnp.float32),
        grid_spec=pltpu.PrefetchScalarGridSpec(
            num_scalar_prefetch=0,
            grid=grid,
            in_specs=[
                pl.BlockSpec((tm, tk), lambda i, k: (i, k)),
                pl.BlockSpec((tk, f), lambda i, k: (k, 0)),
                pl.BlockSpec((f, d), lambda i, k: (0, 0)),
            ],
            out_specs=pl.BlockSpec((tm, d), lambda i, k: (i, 0)),
            scratch_shapes=[pltpu.VMEM((tm, f), jnp.float32)],
        ),
        compiler_params=pltpu.CompilerParams(
            dimension_semantics=("parallel", "arbitrary")),
    )(a_norm, x, w)


# ----------------------------------------------------------------------------
# Kernel 2: fused KMeans (Lloyd) + cdist + softmax, single VMEM-resident kernel
# ----------------------------------------------------------------------------

def kmeans_softmax_kernel(z_ref, o_ref, *, k, num_iters):
    z = z_ref[...]                                           # (N, D), VMEM-resident
    n = z.shape[0]
    kp = o_ref.shape[1]                                      # lane-padded K

    # Loop-invariant terms hoisted out of the Lloyd loop.
    z2 = jnp.sum(z * z, axis=1, keepdims=True)               # (N, 1)
    ones_n = jnp.ones((n, 1), jnp.float32)
    col = lax.broadcasted_iota(jnp.int32, (n, k), 1)

    def sq_dists(c):
        # ||z_i - c_j||^2 via expansion; contract last dims — no transpose of c.
        cross = lax.dot_general(z, c, (((1,), (1,)), ((), ())),
                                preferred_element_type=jnp.float32)    # (N, K)
        c2 = jnp.sum(c * c, axis=1, keepdims=True)                     # (K, 1)
        # Broadcast ||c||^2 across rows with a tiny MXU dot instead of an
        # in-kernel transpose (avoids an XLU relayout on sub-tile shapes).
        c2_row = lax.dot_general(ones_n, c2, (((1,), (1,)), ((), ())),
                                 preferred_element_type=jnp.float32)   # (N, K)
        return jnp.maximum(z2 + c2_row - 2.0 * cross, 0.0)

    def lloyd_step(_, centers):
        d2 = sq_dists(centers)                               # squared: argmin-equivalent
        m = jnp.min(d2, axis=1, keepdims=True)
        first = jnp.min(jnp.where(d2 == m, col, k), axis=1, keepdims=True)
        onehot = (col == first).astype(jnp.float32)          # exact argmin one-hot
        counts = lax.dot_general(onehot, ones_n, (((0,), (0,)), ((), ())),
                                 preferred_element_type=jnp.float32)   # (K, 1)
        sums = lax.dot_general(onehot, z, (((0,), (0,)), ((), ())),
                               preferred_element_type=jnp.float32)     # (K, D)
        new_centers = sums / jnp.maximum(counts, 1.0)
        return jnp.where(counts > 0.0, new_centers, centers)

    # TODO(synk): sklearn KMeans uses randomized k-means++ init (n_init=1);
    # deterministic init (first K embeddings) is used here instead.
    centers0 = z[:k, :]
    centers = lax.fori_loop(0, num_iters, lloyd_step, centers0)

    # Final probas = softmax(-cdist(z, centers), axis=1); sqrt only here.
    neg = -jnp.sqrt(sq_dists(centers))
    mx = jnp.max(neg, axis=1, keepdims=True)
    e = jnp.exp(neg - mx)
    p = e / jnp.sum(e, axis=1, keepdims=True)                # (N, K)

    if kp > k:                                               # lane-dense padded store
        p = jnp.concatenate([p, jnp.zeros((n, kp - k), jnp.float32)], axis=1)
    o_ref[...] = p


def kmeans_softmax_probas(embeddings, k, *, num_iters=10):
    # TODO(synk): for very large N, tile this kernel over node blocks with a
    # grid + cross-block count/sum accumulators; whole-array residency is fine
    # for (N, D) embeddings up to several-MB scale.
    n, d = embeddings.shape
    kp = max(128, ((k + 127) // 128) * 128)                  # lane-dense output slab
    kern = functools.partial(kmeans_softmax_kernel, k=k, num_iters=num_iters)
    out = pl.pallas_call(
        kern,
        out_shape=jax.ShapeDtypeStruct((n, kp), jnp.float32),
        in_specs=[pl.BlockSpec((n, d), lambda: (0, 0))],
        out_specs=pl.BlockSpec((n, kp), lambda: (0, 0)),
    )(embeddings.astype(jnp.float32))
    return out[:, :k]


# ----------------------------------------------------------------------------
# Glue: adjacency normalization, model wrapper
# ----------------------------------------------------------------------------

def normalized_adjacency(edge_index, num_nodes):
    """Dense D^-1/2 (A + I) D^-1/2 from a (2, E) edge_index — plain JAX glue."""
    # TODO(synk): at production N, replace the dense (N,N) adjacency with a
    # sparse gather/segment-sum formulation (scalar-prefetched neighbor lists).
    src, dst = edge_index[0], edge_index[1]
    a = jnp.zeros((num_nodes, num_nodes), jnp.float32)
    a = a.at[src, dst].set(1.0)
    diag = jnp.arange(num_nodes)
    a = a.at[diag, diag].set(1.0)          # self-loops (idempotent if present)
    deg = jnp.sum(a, axis=1)
    d_inv_sqrt = 1.0 / jnp.sqrt(jnp.maximum(deg, 1e-12))
    return a * d_inv_sqrt[:, None] * d_inv_sqrt[None, :]


class OpenSSLPallas:
    """Pallas/JAX re-implementation of OpenSSL.forward / inference."""

    def __init__(self, in_dim, hidden_dim, out_dim, key, *,
                 compute_dtype=jnp.float32, kmeans_iters=10):
        self.out_dim = out_dim
        self.compute_dtype = compute_dtype
        self.kmeans_iters = kmeans_iters
        # Deterministic encoder weight (single GCN-style layer).
        self.w = jax.random.normal(key, (in_dim, hidden_dim), jnp.float32) * 0.1

    def encoder(self, x, edge_index):
        a_norm = normalized_adjacency(edge_index, x.shape[0])
        return gcn_encode(a_norm, x, self.w, compute_dtype=self.compute_dtype)

    def forward(self, x, edge_index):
        logits = self.encoder(x, edge_index)                  # (N, D)
        # KMeans-on-detached-embeddings + cdist + softmax fused into one
        # kernel; forward value of logits vs detach(logits) is identical.
        return kmeans_softmax_probas(logits, self.out_dim,
                                     num_iters=self.kmeans_iters)

    def inference(self, x, edge_index):
        return jnp.argmax(self.forward(x, edge_index), axis=1)

    # TODO(synk): ssl_loss / train_one_epoch depend on the injected `ssl`
    # module (DGI-style) and an optimizer; not part of the forward hot path.


# ----------------------------------------------------------------------------
# Main
# ----------------------------------------------------------------------------

if __name__ == "__main__":
    N, F_IN, HIDDEN, OUT_DIM = 8, 32, 128, 4

    key = jax.random.PRNGKey(0)
    k_x, k_w = jax.random.split(key)

    # Node features (N, F_IN)
    x = jax.random.normal(k_x, (N, F_IN), jnp.float32)

    # Deterministic ring graph, both directions: (2, 2N) edge_index
    idx = jnp.arange(N)
    src = jnp.concatenate([idx, (idx + 1) % N])
    dst = jnp.concatenate([(idx + 1) % N, idx])
    edge_index = jnp.stack([src, dst], axis=0).astype(jnp.int32)

    model = OpenSSLPallas(F_IN, HIDDEN, OUT_DIM, k_w)

    probas = jax.block_until_ready(model.forward(x, edge_index))
    preds = jax.block_until_ready(model.inference(x, edge_index))

    # sanity: softmax rows sum to 1
    assert probas.shape == (N, OUT_DIM)
    assert bool(jnp.allclose(jnp.sum(probas, axis=1), 1.0, atol=1e-5))
    assert preds.shape == (N,)

    print("KERNEL_OK")
</pallas_src>

<mosaic_0001>
module attributes {stable_mosaic.version = 11 : i64} {
  func.func @gcn_encoder_kernel(%arg0: i32, %arg1: i32, %arg2: memref<8x8xf32, #tpu.memory_space<vmem>>, %arg3: memref<8x32xf32, #tpu.memory_space<vmem>>, %arg4: memref<32x128xf32, #tpu.memory_space<vmem>>, %arg5: memref<8x128xf32, #tpu.memory_space<vmem>>, %arg6: memref<8x32xf32, #tpu.memory_space<vmem>>) attributes {dimension_semantics = [#tpu.dimension_semantics<parallel>, #tpu.dimension_semantics<arbitrary>], iteration_bounds = array<i64: 1, 1>, scalar_prefetch = 0 : i64, scratch_operands = 1 : i64, tpu.core_type = #tpu.core_type<tc>, window_params = [{transform_indices = @transform_0, window_bounds = array<i64: 8, 8>}, {transform_indices = @transform_1, window_bounds = array<i64: 8, 32>}, {pipeline_mode = #tpu.pipeline_mode<synchronous>, transform_indices = @transform_2, window_bounds = array<i64: 32, 128>}, {transform_indices = @transform_3, window_bounds = array<i64: 8, 128>}]} {
    %c0_i32 = arith.constant 0 : i32
    %0 = arith.cmpi eq, %arg1, %c0_i32 : i32
    %1 = arith.extui %0 : i1 to i32
    %c0_i32_0 = arith.constant 0 : i32
    %2 = arith.cmpi ne, %1, %c0_i32_0 : i32
    scf.if %2 {
      %cst_10 = arith.constant 0.000000e+00 : f32
      %12 = vector.broadcast %cst_10 : f32 to vector<8x32xf32>
      %c0_11 = arith.constant 0 : index
      %c0_12 = arith.constant 0 : index
      %13 = vector.load %arg6[%c0_11, %c0_12] : memref<8x32xf32, #tpu.memory_space<vmem>>, vector<8x32xf32>
      tpu.vector_store %arg6[%c0_11, %c0_12], %12 {strides = array<i32>} : memref<8x32xf32, #tpu.memory_space<vmem>>, vector<8x32xf32>,
    } else {
    }
    %c0 = arith.constant 0 : index
    %c0_1 = arith.constant 0 : index
    %3 = vector.load %arg6[%c0, %c0_1] : memref<8x32xf32, #tpu.memory_space<vmem>>, vector<8x32xf32>
    %c0_2 = arith.constant 0 : index
    %c0_3 = arith.constant 0 : index
    %4 = vector.load %arg2[%c0_2, %c0_3] : memref<8x8xf32, #tpu.memory_space<vmem>>, vector<8x8xf32>
    %c0_4 = arith.constant 0 : index
    %c0_5 = arith.constant 0 : index
    %5 = vector.load %arg3[%c0_4, %c0_5] : memref<8x32xf32, #tpu.memory_space<vmem>>, vector<8x32xf32>
    %cst = arith.constant dense<0.000000e+00> : vector<8x32xf32>
    %6 = tpu.matmul %4, %5, %cst {dimension_numbers = #tpu.dot_dimension_numbers<[1], [0], [0], [1], [0, 0, 1, 1], [], []>} : vector<8x8xf32>, vector<8x32xf32>, vector<8x32xf32> -> vector<8x32xf32>
    %7 = arith.addf %3, %6 : vector<8x32xf32>
    %c0_6 = arith.constant 0 : index
    %c0_7 = arith.constant 0 : index
    %8 = vector.load %arg6[%c0_6, %c0_7] : memref<8x32xf32, #tpu.memory_space<vmem>>, vector<8x32xf32>
    tpu.vector_store %arg6[%c0_6, %c0_7], %7 {strides = array<i32>} : memref<8x32xf32, #tpu.memory_space<vmem>>, vector<8x32xf32>,
    %c0_i32_8 = arith.constant 0 : i32
    %9 = arith.cmpi eq, %arg1, %c0_i32_8 : i32
    %10 = arith.extui %9 : i1 to i32
    %c0_i32_9 = arith.constant 0 : i32
    %11 = arith.cmpi ne, %10, %c0_i32_9 : i32
    scf.if %11 {
      %c0_10 = arith.constant 0 : index
      %c0_11 = arith.constant 0 : index
      %12 = vector.load %arg6[%c0_10, %c0_11] : memref<8x32xf32, #tpu.memory_space<vmem>>, vector<8x32xf32>
      %c0_12 = arith.constant 0 : index
      %c0_13 = arith.constant 0 : index
      %13 = vector.load %arg4[%c0_12, %c0_13] : memref<32x128xf32, #tpu.memory_space<vmem>>, vector<32x128xf32>
      %cst_14 = arith.constant dense<0.000000e+00> : vector<8x128xf32>
      %14 = tpu.matmul %12, %13, %cst_14 {dimension_numbers = #tpu.dot_dimension_numbers<[1], [0], [0], [1], [0, 0, 1, 1], [], []>} : vector<8x32xf32>, vector<32x128xf32>, vector<8x128xf32> -> vector<8x128xf32>
      %c0_15 = arith.constant 0 : index
      %c0_16 = arith.constant 0 : index
      %15 = vector.load %arg5[%c0_15, %c0_16] : memref<8x128xf32, #tpu.memory_space<vmem>>, vector<8x128xf32>
      tpu.vector_store %arg5[%c0_15, %c0_16], %14 {strides = array<i32>} : memref<8x128xf32, #tpu.memory_space<vmem>>, vector<8x128xf32>,
    } else {
    }
    return
  }
  func.func @transform_0(%arg0: i32, %arg1: i32) -> (i32, i32) {
    %c0_i32 = arith.constant 0 : i32
    return %arg0, %arg1 : i32, i32
  }
  func.func @transform_1(%arg0: i32, %arg1: i32) -> (i32, i32) {
    %c0_i32 = arith.constant 0 : i32
    %c0_i32_0 = arith.constant 0 : i32
    return %arg1, %c0_i32 : i32, i32
  }
  func.func @transform_2(%arg0: i32, %arg1: i32) -> (i32, i32) {
    %c0_i32 = arith.constant 0 : i32
    %c0_i32_0 = arith.constant 0 : i32
    %c0_i32_1 = arith.constant 0 : i32
    return %c0_i32, %c0_i32_0 : i32, i32
  }
  func.func @transform_3(%arg0: i32, %arg1: i32) -> (i32, i32) {
    %c0_i32 = arith.constant 0 : i32
    %c0_i32_0 = arith.constant 0 : i32
    return %arg0, %c0_i32 : i32, i32
  }
}

</mosaic_0001>

<bundles_post_ra>
// kernel: tpu_custom_call.1
= control target key start
LH: loop header
LB: loop body
LE: loop exit
PB: predicated region body
PF: predicated region fallthrough
CT: control target
= control target key end

     0   :  { %8 = vsyncpa [#allocation4], 0  ;;  %s398_s0 = inlined_call_operand.hbm [shape: f32[8,8], index: 0, kind: input, shape index: {}]   ;;  %s399_s1 = inlined_call_operand.hbm [shape: f32[8,32], index: 1, kind: input, shape index: {}]   ;;  %s400_s2 = inlined_call_operand.hbm [shape: f32[32,128], index: 2, kind: input, shape index: {}]   ;;  %s401_s3 = inlined_call_operand.hbm [shape: f32[8,128], index: 3, kind: output, shape index: {}]  }
   0x1   :  { %9 = vsyncpa [#allocation7], 0 }
   0x2   :  { %10 = vsyncpa [#allocation5], 0  ;;  %s355_s12 = smov [#allocation6]   ;;  %s356_s14 = smov [#allocation3]  }
   0x3   :  { %s27_s13 = sshll.u32 %s355_s12, 4  ;;  %s17_s15 = sshll.u32 %s356_s14, 4  ;;  %s28_s13 = int_to_ptr.vmem [resolvable:$true] %s27_s13  ;;  %s18_s15 = int_to_ptr.vmem [resolvable:$true] %s17_s15 }
   0x4   :  { %s277_s16 = scalar_lea.vmem %s28_s13, 128  ;;  %p282_p1 = scmp.lt.s32.totalorder %s28_s13, %s28_s13 }
   0x5   :  { %p278_p0 = scmp.ne.s32.totalorder %s28_s13, %s277_s16  ;;  %p283_p2 = scmp.lt.s32.totalorder %s277_s16, %s277_s16 }
   0x7   :  { %p284_p3 = por %p283_p2, %p282_p1 }
   0x9   :  { %p285_p4 = pnand %p284_p3, %p278_p0 }
   0xb   :  { %288 = shalt.err (!%p285_p4)
}
   0xc   :  { %30 = dma.hbm_to_vmem [thread:$0]  %s399_s1, 128, %s28_s13, [#allocation7]  }
   0xd   :  { %s297_s19 = scalar_lea.vmem %s18_s15, 128  ;;  %p302_p6 = scmp.lt.s32.totalorder %s18_s15, %s18_s15 }
   0xe   :  { %p298_p5 = scmp.ne.s32.totalorder %s18_s15, %s297_s19  ;;  %p303_p7 = scmp.lt.s32.totalorder %s297_s19, %s297_s19 }
  0x10   :  { %p304_p8 = por %p303_p7, %p302_p6 }
  0x12   :  { %p305_p9 = pnand %p304_p8, %p298_p5 }
  0x14   :  { %308 = shalt.err (!%p305_p9)
}
  0x15   :  { %20 = dma.hbm_to_vmem [thread:$0]  %s398_s0, 128, %s18_s15, [#allocation4]  }
  0x16   :  { %s357_s22 = smov [#allocation8]  }
  0x17   :  { %s36_s23 = sshll.u32 %s357_s22, 4  ;;  %s37_s23 = int_to_ptr.vmem [resolvable:$true] %s36_s23 }
  0x18   :  { %s317_s24 = scalar_lea.vmem %s37_s23, 512  ;;  %p322_p11 = scmp.lt.s32.totalorder %s37_s23, %s37_s23 }
  0x19   :  { %p318_p10 = scmp.ne.s32.totalorder %s37_s23, %s317_s24  ;;  %p323_p12 = scmp.lt.s32.totalorder %s317_s24, %s317_s24 }
  0x1b   :  { %p324_p13 = por %p323_p12, %p322_p11 }
  0x1d   :  { %p325_p0 = pnand %p324_p13, %p318_p10 }
  0x1f   :  { %328 = shalt.err (!%p325_p0)
}
  0x20   :  { %s358_s1 = smov 128   ;;  %s359_s25 = smov 8  }
  0x21   :  { %42 = dma.hbm_to_vmem [thread:$0]  %s400_s2, 512, %s37_s23, [#allocation7], %s358_s1, %s358_s1, %s359_s25  }
  0x22   :  { %349 = dma.done.wait [#allocation4], 128  }
  0x23   :  { %350 = vsyncadd [#allocation4], 4294967168 }
  0x24   :  { %351 = dma.done.wait [#allocation7], 640  }
  0x25   :  { %352 = vsyncadd [#allocation7], 4294966656  ;;  %vm56_vm0 = vcmask 261120   ;;  %v360_v0 = vmov 0.0   ;;  %vm361_vm1 = vmmov 0   ;;  %vm61_vm2 = vcmask 64512  }
  0x26   :  { %245 = vmatprep.subr.mxu0 %v360_v0  ;;  %247 = vmatprep.mubr.msk.f32.mxu0 %vm361_vm1, %v360_v0  ;;  %57 = vst.msk [vmem:[#allocation2] sm:$0xff] %vm56_vm0, %v360_v0  ;;  %v60_v1 = vld [vmem:[#allocation6] sm:$0xff]  ;;  %v59_v2 = vld [vmem:[#allocation3] sm:$0xff]  ;;  %v143_v5 = vld [vmem:[#allocation8 + $0x8] sm:$0xff]  ;;  %s362_s0 = smov [#allocation9]  }
  0x27   :  { %250 = vmatprep.subr.mxu1 %v360_v0  ;;  %258 = vmatprep.mubr.msk.f32.mxu1 %vm361_vm1, %v360_v0  ;;  %v145_v3 = vld [vmem:[#allocation8 + $0x18] sm:$0xff]  ;;  %v144_v4 = vld [vmem:[#allocation8 + $0x10] sm:$0xff]  ;;  %v142_v6 = vld [vmem:[#allocation8] sm:$0xff]  ;;  %s226_s2 = sshll.u32 %s362_s0, 4  ;;  %s227_s2 = int_to_ptr.vmem [resolvable:$true] %s226_s2 }
  0x28   :  { %246 = vmatpush3.msra.mxu0 %v60_v1  ;;  %251 = vmatpush3.msra.mxu1 %v145_v3  ;;  %s329_s28 = scalar_lea.vmem %s227_s2, 128  ;;  %p334_p2 = scmp.lt.s32.totalorder %s227_s2, %s227_s2 }
  0x29   :  { %248 = vmatmul.mubr.msk.f32.vlgmr.msra.gmra.mxu0 %vm61_vm2, %v59_v2  ;;  %252 = vmatprep.subr.mxu1 %v360_v0  ;;  %p330_p1 = scmp.ne.s32.totalorder %s227_s2, %s329_s28  ;;  %p335_p3 = scmp.lt.s32.totalorder %s329_s28, %s329_s28 }
  0x2a   :  { %253 = vmatpush3.msra.mxu1 %v144_v4 }
  0x2b   :  { %254 = vmatprep.subr.mxu1 %v360_v0  ;;  %p336_p4 = por %p335_p3, %p334_p2 }
  0x2c   :  { %255 = vmatpush3.msra.mxu1 %v143_v5 }
  0x2d   :  { %256 = vmatprep.subr.mxu1 %v360_v0  ;;  %v58_v7 = vld [vmem:[#allocation2] sm:$0xff]  ;;  %p337_p5 = pnand %p336_p4, %p330_p1 }
  0x2e   :  { %257 = vmatpush3.msra.mxu1 %v142_v6 }
  0xe9   :  { %v131_v8 = vpop.f32.mrf.mxu0 }
  0xea   :  { %v135_v9 = vadd.f32 %v131_v8, %v58_v7 }
  0xeb   :  { %v249_v10 = vpop.f32.mrf.mxu0 }
  0xec   :  { %137 = vst.msk [vmem:[#allocation2] sm:$0xff] %vm56_vm0, %v135_v9 }
  0xf3   :  { %v141_v11 = vld [vmem:[#allocation2] sm:$0xff] }
  0xf4   :  { %259 = vmatmul.mubr.msk.f32.vlgmr.msra.gmra.mxu1 %vm56_vm0, %v141_v11 }
 0x1b4   :  { %v215_v12 = vpop.f32.mrf.mxu1 }
 0x1b5   :  { %219 = vst [vmem:[#allocation9] sm:$0xff] %v215_v12 }
 0x1b6   :  { %v260_v13 = vpop.f32.mrf.mxu1 }
 0x1b7   :  { %340 = shalt.err (!%p337_p5)
}
 0x1b8   :  { %229 = dma.vmem_to_hbm [thread:$0]  %s227_s2, 128, %s401_s3, [#allocation5]  }
 0x1b9   :  { %353 = dma.done.wait [#allocation5], 128  }
 0x1ba   :  { %354 = vsyncadd [#allocation5], 4294967168 }
 0x1bb   :  { %233 = vsyncpa [#allocation4], 1 }
 0x1bc   :  { %234 = vsyncpa [#allocation7], 1 }
 0x1bd   :  { %235 = vsyncpa [#allocation5], 1 }

</bundles_post_ra>
